<compile_context>
chip_gen: v6e
topology: v6e:2x2x1
jax: 0.10.0
libtpu: 0.0.40
codegen_flags: <defaults>
</compile_context>

<pallas_src>
import jax
import jax.numpy as jnp
from jax import lax
from jax.experimental import pallas as pl
from jax.experimental.pallas import tpu as pltpu


def _sentcls_kernel(h_ref, w_ref, b_ref, y_ref, logits_ref, loss_ref, acc_ref):
    # h_ref:      (TB, D)      bf16/f32  CLS hidden states for this batch tile
    # w_ref:      (C_pad, D)   bf16/f32  classifier weight, torch (out, in) layout
    # b_ref:      (1, C_pad)   f32       classifier bias (zero padded)
    # y_ref:      (TB, C_pad)  int32     labels; entries < 0 (incl. padding) are masked
    # logits_ref: (TB, C_pad)  f32       lane-dense logits output
    # loss_ref:   (1, 1)       f32 SMEM  scalar loss (written at last grid step)
    # acc_ref:    (2,)         f32 SMEM  running (loss_sum, mask_count)
    pid = pl.program_id(0)

    @pl.when(pid == 0)
    def _init():
        acc_ref[0] = jnp.float32(0.0)
        acc_ref[1] = jnp.float32(0.0)

    # Linear head on the MXU: contract axis 1 of both operands (no transpose needed).
    logits = lax.dot_general(
        h_ref[...], w_ref[...],
        dimension_numbers=(((1,), (1,)), ((), ())),
        preferred_element_type=jnp.float32,
    ) + b_ref[...]
    logits_ref[...] = logits

    # Masked BCE-with-logits (numerically stable); elementwise math in f32 on the
    # VPU, exp/log1p on the EUP.  Padded / ignored entries have label < 0 so the
    # mask also neutralizes the lane/batch padding.
    y_i = y_ref[...]
    mask = (y_i >= 0).astype(jnp.float32)
    y = y_i.astype(jnp.float32)
    x = logits
    elem = jnp.maximum(x, 0.0) - x * y + jnp.log1p(jnp.exp(-jnp.abs(x)))
    acc_ref[0] += jnp.sum(elem * mask)
    acc_ref[1] += jnp.sum(mask)

    @pl.when(pid == pl.num_programs(0) - 1)
    def _finalize():
        # Guard the all-masked case (PyTorch would produce NaN on an empty selection).
        loss_ref[0, 0] = acc_ref[0] / jnp.maximum(acc_ref[1], 1.0)


def sentcls_head(last_hidden_state, weight, bias, sentence_labels, *, block_b=256):
    """Pallas implementation of SentCls.forward's classification head + loss.

    last_hidden_state: (B, S, D) float (bf16 preferred; fed straight to the MXU)
    weight:            (C, D)    float (torch nn.Linear layout, NOT pre-transposed)
    bias:              (C,)      float
    sentence_labels:   (B, C)    int32, entries < 0 are masked out of the loss
    """
    B, S, D = last_hidden_state.shape
    C = weight.shape[0]

    # Lane-dense class dim: pad C up to a multiple of 128 so every vector store is
    # an unmasked vst.  (In production, pad the parameters once at init.)
    C_pad = max(128, ((C + 127) // 128) * 128)

    # Batch tiling: one resident tile for small B, otherwise a pipelined grid.
    # For very large D on v7x (64 MiB VMEM), shrink block_b / set vmem_limit_bytes.
    TB = B if B <= block_b else block_b
    grid_b = pl.cdiv(B, TB)
    B_pad = grid_b * TB

    # Fuse the CLS slice into the kernel: (B,S,D)->(B,S*D) is free for contiguous
    # row-major data, and a (TB, D) block at column 0 reads exactly the s=0 rows
    # from HBM.  Needs D % 128 == 0 (true for real d_model, e.g. 768/1024);
    # otherwise fall back to a wrapper slice.
    if D % 128 == 0:
        h2d = last_hidden_state.reshape(B, S * D)
    else:
        h2d = last_hidden_state[:, 0, :]
    if B_pad != B:
        h2d = jnp.zeros((B_pad, h2d.shape[1]), h2d.dtype).at[:B].set(h2d)

    w_pad = jnp.zeros((C_pad, D), weight.dtype).at[:C].set(weight)
    b_pad = jnp.zeros((1, C_pad), jnp.float32).at[0, :C].set(bias.astype(jnp.float32))
    y_pad = jnp.full((B_pad, C_pad), -1, jnp.int32).at[:B, :C].set(
        sentence_labels.astype(jnp.int32))

    logits_pad, loss = pl.pallas_call(
        _sentcls_kernel,
        out_shape=(
            jax.ShapeDtypeStruct((B_pad, C_pad), jnp.float32),   # logits (lane-dense)
            jax.ShapeDtypeStruct((1, 1), jnp.float32),           # scalar loss (SMEM)
        ),
        grid_spec=pltpu.PrefetchScalarGridSpec(
            num_scalar_prefetch=0,
            grid=(grid_b,),
            in_specs=[
                pl.BlockSpec((TB, D), lambda i: (i, 0)),        # CLS rows only
                pl.BlockSpec((C_pad, D), lambda i: (0, 0)),     # weight (resident)
                pl.BlockSpec((1, C_pad), lambda i: (0, 0)),     # bias (resident)
                pl.BlockSpec((TB, C_pad), lambda i: (i, 0)),    # int32 labels
            ],
            out_specs=(
                pl.BlockSpec((TB, C_pad), lambda i: (i, 0)),    # logits
                pl.BlockSpec(memory_space=pltpu.SMEM),          # loss scalar
            ),
            scratch_shapes=[pltpu.SMEM((2,), jnp.float32)],     # (loss_sum, count)
        ),
        compiler_params=pltpu.CompilerParams(
            # The SMEM loss accumulator makes the batch axis a reduction; keep it
            # "arbitrary" so megacore never splits the single accumulator.
            dimension_semantics=("arbitrary",),
        ),
    )(h2d, w_pad, b_pad, y_pad)

    logits = logits_pad[:B, :C]
    preds = (logits > 0.0).astype(jnp.int32)   # sigmoid-path prediction (== .long())
    return {
        "loss": loss[0, 0],
        "prediction": preds,
        "label": sentence_labels.astype(jnp.int32),
        "logits": logits,
    }


if __name__ == "__main__":
    # Small deterministic setup: batch B=2, seq S=8, d_model D=128 (multiple of 128
    # so the fused CLS slice path is exercised), nclass=5 -> C = nclass-1 = 4.
    B, S, D = 2, 8, 128
    NCLASS = 5
    C = NCLASS - 1

    key = jax.random.PRNGKey(0)
    k_h, k_w, k_b, k_y = jax.random.split(key, 4)

    # TODO(synk): the pretrained transformers.AutoModel encoder is an external
    # checkpointed model; its last_hidden_state is synthesized here (bf16, as a
    # real encoder would emit).
    last_hidden_state = jax.random.normal(
        k_h, (B, S, D), dtype=jnp.float32).astype(jnp.bfloat16)

    # role_cls = nn.Linear(d_model, nclass-1), torch (out_features, in_features) layout.
    weight = (jax.random.normal(k_w, (C, D), dtype=jnp.float32)
              / jnp.sqrt(D)).astype(jnp.bfloat16)
    bias = jax.random.normal(k_b, (C,), dtype=jnp.float32) * 0.01

    # Multi-label sentence labels in {0, 1}, with one masked (-1) entry.
    sentence_labels = jax.random.bernoulli(k_y, 0.5, (B, C)).astype(jnp.int32)
    sentence_labels = sentence_labels.at[0, 1].set(-1)

    out = sentcls_head(last_hidden_state, weight, bias, sentence_labels)
    jax.block_until_ready(out)

    # Pure-JAX reference (f32 math on the same bf16 operands).
    cls = last_hidden_state[:, 0, :].astype(jnp.float32)
    ref_logits = cls @ weight.astype(jnp.float32).T + bias
    ref_preds = (ref_logits > 0).astype(jnp.int32)
    y = sentence_labels.astype(jnp.float32)
    mask = (y >= 0).astype(jnp.float32)
    x = ref_logits
    elem = jnp.maximum(x, 0.0) - x * y + jnp.log1p(jnp.exp(-jnp.abs(x)))
    ref_loss = jnp.sum(elem * mask) / jnp.maximum(jnp.sum(mask), 1.0)

    assert jnp.allclose(out["logits"], ref_logits, atol=1e-3, rtol=1e-3), "logits mismatch"
    assert jnp.array_equal(out["prediction"], ref_preds), "prediction mismatch"
    assert jnp.allclose(out["loss"], ref_loss, atol=1e-3, rtol=1e-3), "loss mismatch"

    print("KERNEL_OK")
</pallas_src>

<mosaic_0001>
module attributes {stable_mosaic.version = 11 : i64} {
  func.func @_sentcls_kernel(%arg0: i32, %arg1: memref<2x128xbf16, #tpu.memory_space<vmem>>, %arg2: memref<128x128xbf16, #tpu.memory_space<vmem>>, %arg3: memref<1x128xf32, #tpu.memory_space<vmem>>, %arg4: memref<2x128xi32, #tpu.memory_space<vmem>>, %arg5: memref<2x128xf32, #tpu.memory_space<vmem>>, %arg6: memref<1x1xf32, #tpu.memory_space<smem>>, %arg7: memref<2xf32, #tpu.memory_space<smem>>) attributes {dimension_semantics = [#tpu.dimension_semantics<arbitrary>], iteration_bounds = array<i64: 1>, scalar_prefetch = 0 : i64, scratch_operands = 1 : i64, tpu.core_type = #tpu.core_type<tc>, window_params = [{transform_indices = @transform_0, window_bounds = array<i64: 2, 128>}, {pipeline_mode = #tpu.pipeline_mode<synchronous>, transform_indices = @transform_1, window_bounds = array<i64: 128, 128>}, {pipeline_mode = #tpu.pipeline_mode<synchronous>, transform_indices = @transform_2, window_bounds = array<i64: 1, 128>}, {transform_indices = @transform_3, window_bounds = array<i64: 2, 128>}, {transform_indices = @transform_4, window_bounds = array<i64: 2, 128>}, {transform_indices = @transform_5, window_bounds = array<i64: 1, 1>}]} {
    %c0_i32 = arith.constant 0 : i32
    %0 = arith.cmpi eq, %arg0, %c0_i32 : i32
    %1 = arith.extui %0 : i1 to i32
    %c0_i32_0 = arith.constant 0 : i32
    %2 = arith.cmpi ne, %1, %c0_i32_0 : i32
    scf.if %2 {
      %cst_20 = arith.constant 0.000000e+00 : f32
      %c0_21 = arith.constant 0 : index
      %44 = memref.load %arg7[%c0_21] : memref<2xf32, #tpu.memory_space<smem>>
      memref.store %cst_20, %arg7[%c0_21] : memref<2xf32, #tpu.memory_space<smem>>
      %cst_22 = arith.constant 0.000000e+00 : f32
      %c1_23 = arith.constant 1 : index
      %45 = memref.load %arg7[%c1_23] : memref<2xf32, #tpu.memory_space<smem>>
      memref.store %cst_22, %arg7[%c1_23] : memref<2xf32, #tpu.memory_space<smem>>
    } else {
    }
    %c0 = arith.constant 0 : index
    %c0_1 = arith.constant 0 : index
    %3 = vector.load %arg1[%c0, %c0_1] : memref<2x128xbf16, #tpu.memory_space<vmem>>, vector<2x128xbf16>
    %c0_2 = arith.constant 0 : index
    %c0_3 = arith.constant 0 : index
    %4 = vector.load %arg2[%c0_2, %c0_3] : memref<128x128xbf16, #tpu.memory_space<vmem>>, vector<128x128xbf16>
    %cst = arith.constant dense<0.000000e+00> : vector<2x128xf32>
    %5 = tpu.matmul %3, %4, %cst {dimension_numbers = #tpu.dot_dimension_numbers<[1], [1], [0], [0], [0, 0, 1, 0], [], []>} : vector<2x128xbf16>, vector<128x128xbf16>, vector<2x128xf32> -> vector<2x128xf32>
    %c0_4 = arith.constant 0 : index
    %c0_5 = arith.constant 0 : index
    %6 = vector.load %arg3[%c0_4, %c0_5] : memref<1x128xf32, #tpu.memory_space<vmem>>, vector<1x128xf32>
    %7 = vector.broadcast %6 : vector<1x128xf32> to vector<2x128xf32>
    %8 = arith.addf %5, %7 : vector<2x128xf32>
    %c0_6 = arith.constant 0 : index
    %c0_7 = arith.constant 0 : index
    %9 = vector.load %arg5[%c0_6, %c0_7] : memref<2x128xf32, #tpu.memory_space<vmem>>, vector<2x128xf32>
    tpu.vector_store %arg5[%c0_6, %c0_7], %8 {strides = array<i32>} : memref<2x128xf32, #tpu.memory_space<vmem>>, vector<2x128xf32>,
    %c0_8 = arith.constant 0 : index
    %c0_9 = arith.constant 0 : index
    %10 = vector.load %arg4[%c0_8, %c0_9] : memref<2x128xi32, #tpu.memory_space<vmem>>, vector<2x128xi32>
    %c0_i32_10 = arith.constant 0 : i32
    %11 = vector.broadcast %c0_i32_10 : i32 to vector<2x128xi32>
    %12 = arith.cmpi sge, %10, %11 : vector<2x128xi32>
    %13 = arith.extui %12 : vector<2x128xi1> to vector<2x128xi32>
    %14 = arith.sitofp %13 : vector<2x128xi32> to vector<2x128xf32>
    %15 = arith.sitofp %10 : vector<2x128xi32> to vector<2x128xf32>
    %cst_11 = arith.constant 0.000000e+00 : f32
    %16 = vector.broadcast %cst_11 : f32 to vector<2x128xf32>
    %17 = arith.maximumf %8, %16 : vector<2x128xf32>
    %18 = arith.mulf %8, %15 : vector<2x128xf32>
    %19 = arith.subf %17, %18 : vector<2x128xf32>
    %20 = math.absf %8 : vector<2x128xf32>
    %cst_12 = arith.constant 0.000000e+00 : f32
    %21 = vector.broadcast %cst_12 : f32 to vector<2x128xf32>
    %22 = arith.subf %21, %20 : vector<2x128xf32>
    %23 = math.exp %22 : vector<2x128xf32>
    %24 = math.log1p %23 : vector<2x128xf32>
    %25 = arith.addf %19, %24 : vector<2x128xf32>
    %c0_13 = arith.constant 0 : index
    %26 = memref.load %arg7[%c0_13] : memref<2xf32, #tpu.memory_space<smem>>
    %27 = arith.mulf %25, %14 : vector<2x128xf32>
    %28 = vector.shape_cast %27 : vector<2x128xf32> to vector<1x2x128xf32>
    %cst_14 = arith.constant dense<0.000000e+00> : vector<1xf32>
    %29 = vector.multi_reduction <add>, %28, %cst_14 [1, 2] : vector<1x2x128xf32> to vector<1xf32>
    %30 = vector.shape_cast %29 : vector<1xf32> to vector<1x1x1xf32>
    %31 = vector.extract %30[0, 0, 0] : f32 from vector<1x1x1xf32>
    %32 = arith.addf %26, %31 : f32
    %c0_15 = arith.constant 0 : index
    %33 = memref.load %arg7[%c0_15] : memref<2xf32, #tpu.memory_space<smem>>
    memref.store %32, %arg7[%c0_15] : memref<2xf32, #tpu.memory_space<smem>>
    %c1 = arith.constant 1 : index
    %34 = memref.load %arg7[%c1] : memref<2xf32, #tpu.memory_space<smem>>
    %35 = vector.shape_cast %14 : vector<2x128xf32> to vector<1x2x128xf32>
    %cst_16 = arith.constant dense<0.000000e+00> : vector<1xf32>
    %36 = vector.multi_reduction <add>, %35, %cst_16 [1, 2] : vector<1x2x128xf32> to vector<1xf32>
    %37 = vector.shape_cast %36 : vector<1xf32> to vector<1x1x1xf32>
    %38 = vector.extract %37[0, 0, 0] : f32 from vector<1x1x1xf32>
    %39 = arith.addf %34, %38 : f32
    %c1_17 = arith.constant 1 : index
    %40 = memref.load %arg7[%c1_17] : memref<2xf32, #tpu.memory_space<smem>>
    memref.store %39, %arg7[%c1_17] : memref<2xf32, #tpu.memory_space<smem>>
    %c0_i32_18 = arith.constant 0 : i32
    %41 = arith.cmpi eq, %arg0, %c0_i32_18 : i32
    %42 = arith.extui %41 : i1 to i32
    %c0_i32_19 = arith.constant 0 : i32
    %43 = arith.cmpi ne, %42, %c0_i32_19 : i32
    scf.if %43 {
      %c0_20 = arith.constant 0 : index
      %44 = memref.load %arg7[%c0_20] : memref<2xf32, #tpu.memory_space<smem>>
      %c1_21 = arith.constant 1 : index
      %45 = memref.load %arg7[%c1_21] : memref<2xf32, #tpu.memory_space<smem>>
      %cst_22 = arith.constant 1.000000e+00 : f32
      %46 = arith.maximumf %45, %cst_22 : f32
      %47 = arith.divf %44, %46 : f32
      %c0_23 = arith.constant 0 : index
      %c0_24 = arith.constant 0 : index
      %48 = memref.load %arg6[%c0_23, %c0_24] : memref<1x1xf32, #tpu.memory_space<smem>>
      memref.store %47, %arg6[%c0_23, %c0_24] : memref<1x1xf32, #tpu.memory_space<smem>>
    } else {
    }
    return
  }
  func.func @transform_0(%arg0: i32) -> (i32, i32) {
    %c0_i32 = arith.constant 0 : i32
    %c0_i32_0 = arith.constant 0 : i32
    return %arg0, %c0_i32 : i32, i32
  }
  func.func @transform_1(%arg0: i32) -> (i32, i32) {
    %c0_i32 = arith.constant 0 : i32
    %c0_i32_0 = arith.constant 0 : i32
    %c0_i32_1 = arith.constant 0 : i32
    return %c0_i32, %c0_i32_0 : i32, i32
  }
  func.func @transform_2(%arg0: i32) -> (i32, i32) {
    %c0_i32 = arith.constant 0 : i32
    %c0_i32_0 = arith.constant 0 : i32
    %c0_i32_1 = arith.constant 0 : i32
    return %c0_i32, %c0_i32_0 : i32, i32
  }
  func.func @transform_3(%arg0: i32) -> (i32, i32) {
    %c0_i32 = arith.constant 0 : i32
    %c0_i32_0 = arith.constant 0 : i32
    return %arg0, %c0_i32 : i32, i32
  }
  func.func @transform_4(%arg0: i32) -> (i32, i32) {
    %c0_i32 = arith.constant 0 : i32
    %c0_i32_0 = arith.constant 0 : i32
    return %arg0, %c0_i32 : i32, i32
  }
  func.func @transform_5(%arg0: i32) -> (i32, i32) {
    %c0_i32 = arith.constant 0 : i32
    %c0_i32_0 = arith.constant 0 : i32
    %c0_i32_1 = arith.constant 0 : i32
    return %c0_i32, %c0_i32_0 : i32, i32
  }
}

</mosaic_0001>

<bundles_post_ra>
// kernel: tpu_custom_call.1
= control target key start
LH: loop header
LB: loop body
LE: loop exit
PB: predicated region body
PF: predicated region fallthrough
CT: control target
= control target key end

     0   :  { %11 = vsyncpa [#allocation4], 0  ;;  %s465_s0 = inlined_call_operand.hbm [shape: bf16[2,1024], index: 0, kind: input, shape index: {}]   ;;  %s466_s1 = inlined_call_operand.hbm [shape: bf16[128,128], index: 1, kind: input, shape index: {}]   ;;  %s467_s2 = inlined_call_operand.vmem [shape: f32[1,128], index: 2, kind: input, shape index: {}]   ;;  %s468_s3 = inlined_call_operand.vmem [shape: s32[2,128], index: 3, kind: input, shape index: {}]   ;;  %s469_s4 = inlined_call_operand.hbm [shape: f32[2,128], index: 4, kind: output, shape index: {0}]   ;;  %s470_s5 = inlined_call_operand.hbm [shape: f32[1,1], index: 5, kind: output, shape index: {1}]  }
   0x1   :  { %12 = vsyncpa [#allocation8], 0 }
   0x2   :  { %13 = vsyncpa [#allocation5], 0 }
   0x3   :  { %14 = vsyncpa [#allocation6], 0  ;;  %s408_s18 = smov [#allocation3]   ;;  %s409_s20 = smov [#allocation7]  }
   0x4   :  { %s21_s19 = sshll.u32 %s408_s18, 4  ;;  %s30_s21 = sshll.u32 %s409_s20, 4  ;;  %s22_s19 = int_to_ptr.vmem [resolvable:$true] %s21_s19  ;;  %s31_s21 = int_to_ptr.vmem [resolvable:$true] %s30_s21 }
   0x5   :  { %s340_s22 = scalar_lea.vmem %s22_s19, 16  ;;  %s344_s23 = scalar_lea.vmem %s22_s19, 32 }
   0x6   :  { %p341_p0 = scmp.ne.s32.totalorder %s22_s19, %s340_s22  ;;  %p345_p1 = scmp.lt.s32.totalorder %s22_s19, %s22_s19 }
   0x7   :  { %p346_p2 = scmp.lt.s32.totalorder %s344_s23, %s340_s22 }
   0x9   :  { %p347_p3 = por %p346_p2, %p345_p1 }
   0xb   :  { %p348_p4 = pnand %p347_p3, %p341_p0 }
   0xd   :  { %351 = shalt.err (!%p348_p4)
}
   0xe   :  { %24 = dma.hbm_to_vmem [thread:$0]  %s465_s0, 16, %s22_s19, [#allocation4]  }
   0xf   :  { %s360_s26 = scalar_lea.vmem %s31_s21, 1024  ;;  %p365_p6 = scmp.lt.s32.totalorder %s31_s21, %s31_s21 }
  0x10   :  { %p361_p5 = scmp.ne.s32.totalorder %s31_s21, %s360_s26  ;;  %p366_p7 = scmp.lt.s32.totalorder %s360_s26, %s360_s26 }
  0x12   :  { %p367_p8 = por %p366_p7, %p365_p6 }
  0x14   :  { %p368_p9 = pnand %p367_p8, %p361_p5 }
  0x16   :  { %371 = shalt.err (!%p368_p9)
}
  0x17   :  { %s410_s27 = smov 64   ;;  %s411_s28 = smov 4  }
  0x18   :  { %36 = dma.hbm_to_vmem [thread:$0]  %s466_s1, 1024, %s31_s21, [#allocation8], %s410_s27, %s410_s27, %s411_s28  }
  0x19   :  { %400 = dma.done.wait [#allocation4], 16  }
  0x1a   :  { %401 = vsyncadd [#allocation4], 4294967280 }
  0x1b   :  { %402 = dma.done.wait [#allocation8], 1024  }
  0x1c   :  { %403 = vsyncadd [#allocation8], 4294966272  ;;  %v412_v0 = vmov 0.0   ;;  %vm413_vm0 = vmmov 0   ;;  %v318_v1 = vld [vmem:[#allocation7 + $0x38] sm:$0xff]   ;;  %v319_v2 = vld [vmem:[#allocation7 + $0x30] sm:$0xff]  }
  0x1d   :  { %283 = vmatprep.subr.bf16.mxu0 %v412_v0  ;;  %299 = vmatprep.mubr.msk.bf16.mxu0 %vm413_vm0, %v412_v0  ;;  %v320_v3 = vld [vmem:[#allocation7 + $0x28] sm:$0xff]   ;;  %v321_v4 = vld [vmem:[#allocation7 + $0x20] sm:$0xff]   ;;  %v322_v5 = vld [vmem:[#allocation7 + $0x18] sm:$0xff]   ;;  %vm193_vm3 = vcmask 1041408  }
  0x1e   :  { %284 = vmatpush3.bf16.xpose.msra.mxu0 %v318_v1  ;;  %v323_v6 = vld [vmem:[#allocation7 + $0x10] sm:$0xff]   ;;  %v324_v7 = vld [vmem:[#allocation7 + $0x8] sm:$0xff]   ;;  %v325_v8 = vld [vmem:[#allocation7] sm:$0xff]  }
  0x1f   :  { %285 = vmatprep.subr.bf16.mxu0 %v412_v0  ;;  %v56_v9 = vld [vmem:[#allocation3] sm:$0x1] }
  0x20   :  { %v262_v10 = vld [vmem:[%s467_s2] ss:$0 sm:$0xff]  ;;  %s414_s2 = smov [#allocation9]  }
  0x21   :  { %v169_v21 = vld [vmem:[%s468_s3] sm:$0x3]  ;;  %s239_s3 = sshll.u32 %s414_s2, 4  ;;  %s240_s3 = int_to_ptr.vmem [resolvable:$true] %s239_s3 }
  0x22   :  { %v173_v23 = vcvt.s32.f32 %v169_v21  ;;  %vm170_vm1 = vcmp.ge.s32.totalorder %v169_v21, 0  ;;  %s372_s8 = scalar_lea.vmem %s240_s3, 32  ;;  %p377_p11 = scmp.lt.s32.totalorder %s240_s3, %s240_s3 }
  0x23   :  { %v271_v32 = vsel %vm170_vm1, 1.0, %v412_v0  ;;  %p373_p10 = scmp.ne.s32.totalorder %s240_s3, %s372_s8  ;;  %p378_p12 = scmp.lt.s32.totalorder %s372_s8, %s372_s8 }
  0x24   :  { %v208_v37 = vsel %vm193_vm3, %v271_v32, 0.0 }
  0x25   :  { %p379_p13 = por %p378_p12, %p377_p11 }
  0x26   :  { %286 = vmatpush3.bf16.xpose.msra.mxu0 %v319_v2 }
  0x27   :  { %287 = vmatprep.subr.bf16.mxu0 %v412_v0  ;;  %p380_p0 = pnand %p379_p13, %p373_p10 }
  0x2e   :  { %288 = vmatpush3.bf16.xpose.msra.mxu0 %v320_v3 }
  0x2f   :  { %289 = vmatprep.subr.bf16.mxu0 %v412_v0 }
  0x36   :  { %290 = vmatpush3.bf16.xpose.msra.mxu0 %v321_v4 }
  0x37   :  { %291 = vmatprep.subr.bf16.mxu0 %v412_v0 }
  0x3e   :  { %292 = vmatpush3.bf16.xpose.msra.mxu0 %v322_v5 }
  0x3f   :  { %293 = vmatprep.subr.bf16.mxu0 %v412_v0 }
  0x46   :  { %294 = vmatpush3.bf16.xpose.msra.mxu0 %v323_v6 }
  0x47   :  { %295 = vmatprep.subr.bf16.mxu0 %v412_v0 }
  0x4e   :  { %296 = vmatpush3.bf16.xpose.msra.mxu0 %v324_v7 }
  0x4f   :  { %297 = vmatprep.subr.bf16.mxu0 %v412_v0 }
  0x56   :  { %298 = vmatpush3.bf16.xpose.msra.mxu0 %v325_v8 }
  0x5d   :  { %300 = vmatmul.mubr.bf16.vlgmr.msra.gmra.mxu0 %v56_v9 }
 0x11d   :  { %v162_v11 = vpop.f32.mrf.mxu0 }
 0x11e   :  { %v163_v12 = vadd.f32 %v262_v10, %v162_v11 }
 0x11f   :  { %v301_v13 = vpop.f32.mrf.mxu0 }
 0x120   :  { %v177_v14 = vand.u32 2147483647, %v163_v12  ;;  %168 = vst [vmem:[#allocation9] sm:$0x3] %v163_v12  ;;  %v174_v25 = vmax.f32 %v163_v12, 0.0  ;;  %v175_v26 = vmul.f32 %v173_v23, %v163_v12 }
 0x121   :  { %v165_v15 = vpop.f32.mrf.mxu0 }
 0x122   :  { %v178_v16 = vsub.f32 0.0, %v177_v14  ;;  %v176_v31 = vsub.f32 %v174_v25, %v175_v26 }
 0x123   :  { %v302_v17 = vpop.f32.mrf.mxu0 }
 0x124   :  { %v179_v18 = vmul.f32 1.442695, %v178_v16 }
 0x126   :  { %326 = vpow2.f32 %v179_v18 }
 0x133   :  { %v327_v19 = vpop.eup %326 }
 0x134   :  { %v181_v20 = vadd.f32 1.0, %v327_v19  ;;  %v184_v22 = vmul.f32 -0.5, %v327_v19  ;;  %v187_v27 = vand.u32 2147483647, %v327_v19 }
 0x136   :  { %328 = vlog2.f32 %v181_v20  ;;  %v185_v24 = vadd.f32 1.0, %v184_v22  ;;  %vm188_vm2 = vcmp.lt.f32.partialorder %v187_v27, 0.0004427343 }
 0x138   :  { %v186_v30 = vmul.f32 %v327_v19, %v185_v24 }
 0x143   :  { %v329_v28 = vpop.eup %328 }
 0x144   :  { %v183_v29 = vmul.f32 0.6931472, %v329_v28 }
 0x146   :  { %v189_v33 = vsel %vm188_vm2, %v186_v30, %v183_v29 }
 0x147   :  { %v190_v34 = vadd.f32 %v189_v33, %v176_v31 }
 0x149   :  { %v192_v35 = vmul.f32 %v271_v32, %v190_v34 }
 0x14b   :  { %v194_v36 = vsel %vm193_vm3, %v192_v35, 0.0 }
 0x14c   :  { %195 = vadd.xlane.f32.xlu0 %v194_v36 }
 0x150   :  { %209 = vadd.xlane.f32.xlu0 %v208_v37 }
 0x1d5   :  { %v196_v38 = vpop.xlane.xlu0 %195 }
 0x1d6   :  { %v197_v39 = vrot.slane %v196_v38, 4 }
 0x1d8   :  { %v198_v40 = vadd.f32 %v197_v39, %v196_v38 }
 0x1d9   :  { %v210_v41 = vpop.xlane.xlu0 %209 }
 0x1da   :  { %v199_v42 = vrot.slane %v198_v40, 2  ;;  %v211_v43 = vrot.slane %v210_v41, 4 }
 0x1dc   :  { %v212_v44 = vadd.f32 %v211_v43, %v210_v41  ;;  %v200_v45 = vadd.f32 %v199_v42, %v198_v40 }
 0x1dd   :  { %383 = shalt.err (!%p380_p0)
}
 0x1de   :  { %242 = dma.vmem_to_hbm [thread:$0]  %s240_s3, 32, %s469_s4, [#allocation5]   ;;  %v213_v46 = vrot.slane %v212_v44, 2  ;;  %v201_v47 = vrot.slane %v200_v45, 1 }
 0x1df   :  { %s415_s13 = smov 1.0   ;;  %s416_s4 = smov [#allocation10]  }
 0x1e0   :  { %v214_v48 = vadd.f32 %v213_v46, %v212_v44  ;;  %v202_v49 = vadd.f32 %v201_v47, %v200_v45 }
 0x1e2   :  { %303 = vpush %v202_v49  ;;  %v215_v50 = vrot.slane %v214_v48, 1 }
 0x1e4   :  { %v216_v51 = vadd.f32 %v215_v50, %v214_v48 }
 0x1e6   :  { %305 = vpush %v216_v51 }
 0x213   :  { %s304_s11 = spop %303 }
 0x217   :  { %s306_s12 = spop %305 }
 0x218   :  { %s226_s14 = smax.f32 %s415_s13, %s306_s12 }
 0x219   :  { %v227_v52 = vstv %s226_s14 }
 0x21a   :  { %330 = vrcp.f32 %v227_v52 }
 0x227   :  { %v331_v53 = vpop.eup %330 }
 0x228   :  { %307 = vpush %v331_v53 }
 0x259   :  { %s308_s15 = spop %307 }
 0x25a   :  { %s230_s16 = smul.f32 %s308_s15, %s304_s11 }
 0x25c   :  { %232 = sst [smem:[#allocation10]] %s230_s16 }
 0x25d   :  { %250 = dma.smem_to_hbm %s416_s4, 16, %s470_s5, [#allocation6]  }
 0x25e   :  { %404 = dma.done.wait [#allocation5], 32  }
 0x25f   :  { %405 = vsyncadd [#allocation5], 4294967264 }
 0x260   :  { %406 = dma.done.wait [#allocation6], 16  }
 0x261   :  { %407 = vsyncadd [#allocation6], 4294967280 }
 0x262   :  { %257 = sfence }
 0x263   :  { %258 = vsyncpa [#allocation4], 1 }
 0x264   :  { %259 = vsyncpa [#allocation8], 1 }
 0x265   :  { %260 = vsyncpa [#allocation5], 1 }
 0x266   :  { %261 = vsyncpa [#allocation6], 1 }

</bundles_post_ra>
